<compile_context>
chip_gen: v7x
topology: tpu7x:2x2x1
jax: 0.10.0
libtpu: 0.0.40
codegen_flags: <defaults>
</compile_context>

<pallas_src>
import math

import jax
import jax.numpy as jnp
from jax import lax
from jax.experimental import pallas as pl
from jax.experimental.pallas import tpu as pltpu


def _up_conv_kernel(x_ref, w_ref, b_ref, o_ref):
    # x_ref: (1, H+2, W+2, Cin)  bf16  zero-padded, ORIGINAL-resolution input (one batch elem)
    # w_ref: (4*Cout, 9*Cin)     bf16  per-phase effective weights laid out on the 3x3 tap grid
    # b_ref: (4*Cout, 1)         f32   bias replicated per output phase
    # o_ref: (1, 4*Cout, tH*W)   f32   phase-stacked output rows for this row tile
    W = x_ref.shape[2] - 2
    Cin = x_ref.shape[3]
    tHW = o_ref.shape[2]
    tH = tHW // W
    r0 = pl.program_id(1) * tH  # base row of this tile in the padded input

    # im2col of the 3x3 neighborhood at original resolution: (tH*W, 9*Cin).
    # Column order is (dh, dw, ci), matching the weight layout built in the wrapper.
    taps = []
    for dh in range(3):
        rows = pl.ds(r0 + dh, tH)
        for dw in range(3):
            taps.append(x_ref[0, rows, dw:dw + W, :])          # (tH, W, Cin)
    p9 = jnp.concatenate(taps, axis=-1).reshape(tHW, 9 * Cin)  # (tH*W, 9*Cin)

    # One MXU call for all 4 phases:  A @ B^T  (contract the 9*Cin dim), f32 accum.
    acc = lax.dot_general(
        w_ref[...], p9,
        dimension_numbers=(((1,), (1,)), ((), ())),
        preferred_element_type=jnp.float32)                    # (4*Cout, tH*W)

    acc = jnp.maximum(acc + b_ref[...], 0.0)                   # bias + ReLU (f32)
    o_ref[0] = acc.astype(o_ref.dtype)                         # lane-dense store


def _pick_row_tile(H, W):
    """Rows per grid step: tH must divide H and tH*W must be a multiple of 128
    (lane-dense, tileable output block).  Keep >=2 row tiles when possible so the
    pipeline/megacore get more than B units of work, and cap the tile size so
    blocks stay small on v7x/v5e VMEM."""
    step = 128 // math.gcd(W, 128)
    if step >= H or H % step != 0:
        return H  # full-height block (block == full array dims, always legal)
    tH = step
    while (H % (2 * tH) == 0) and ((2 * tH) <= H // 2) and ((2 * tH) * W <= 1024):
        tH *= 2
    return tH


def up_conv_forward(x_nchw, weight_oihw, bias):
    """Equivalent of: Upsample(scale_factor=2, nearest) -> Conv2d(3x3, pad=1) -> ReLU.

    x_nchw:      (B, Cin, H, W)    float32 (PyTorch layout)
    weight_oihw: (Cout, Cin, 3, 3) float32
    bias:        (Cout,)           float32
    returns:     (B, Cout, 2H, 2W) float32 (NCHW, matching PyTorch)
    """
    B, Cin, H, W = x_nchw.shape
    Cout = weight_oihw.shape[0]

    # --- fold the 2x nearest upsample into the conv weights ------------------
    # M[p, dh, kh] = 1 if original row tap kh contributes to effective tap offset
    # dh (into the 1-padded original-res input) for output row phase p.
    M = jnp.array([[[1., 0., 0.],
                    [0., 1., 1.],
                    [0., 0., 0.]],
                   [[0., 0., 0.],
                    [1., 1., 0.],
                    [0., 0., 1.]]], jnp.float32)                 # [phase, eff_tap, orig_tap]
    w_hwio = jnp.transpose(weight_oihw.astype(jnp.float32), (2, 3, 1, 0))   # (kh,kw,ci,co)
    w_mat = jnp.einsum('pdk,qel,klio->pqodei', M, M, w_hwio)     # (2,2,Cout,3,3,Cin)
    w_mat = w_mat.reshape(4 * Cout, 9 * Cin).astype(jnp.bfloat16)
    b_all = jnp.tile(bias.astype(jnp.float32), 4).reshape(4 * Cout, 1)

    # --- small original-resolution glue: NCHW -> NHWC, pad 1, bf16 -----------
    x_nhwc = jnp.transpose(x_nchw, (0, 2, 3, 1)).astype(jnp.bfloat16)
    x_pad = jnp.pad(x_nhwc, ((0, 0), (1, 1), (1, 1), (0, 0)))    # (B, H+2, W+2, Cin)

    tH = _pick_row_tile(H, W)
    n_rt = H // tH

    out_flat = pl.pallas_call(
        _up_conv_kernel,
        out_shape=jax.ShapeDtypeStruct((B, 4 * Cout, H * W), jnp.float32),
        grid_spec=pltpu.PrefetchScalarGridSpec(
            num_scalar_prefetch=0,
            grid=(B, n_rt),
            in_specs=[
                # whole padded batch element stays resident across row tiles
                # (halo-free; re-DMA is skipped when only the row-tile index changes).
                pl.BlockSpec((1, H + 2, W + 2, Cin), lambda b, r: (b, 0, 0, 0)),
                pl.BlockSpec((4 * Cout, 9 * Cin), lambda b, r: (0, 0)),
                pl.BlockSpec((4 * Cout, 1), lambda b, r: (0, 0)),
            ],
            out_specs=pl.BlockSpec((1, 4 * Cout, tH * W), lambda b, r: (b, 0, r)),
        ),
        compiler_params=pltpu.CompilerParams(
            dimension_semantics=("parallel", "parallel")),
    )(x_pad, w_mat, b_all)

    # (B, [p,q,co], [r,c]) -> NCHW (B, Cout, 2H, 2W): one reshape + transpose pass.
    y = out_flat.reshape(B, 2, 2, Cout, H, W)
    y = jnp.transpose(y, (0, 3, 4, 1, 5, 2))                     # (B, Cout, H, p, W, q)
    return y.reshape(B, Cout, 2 * H, 2 * W)


def _reference(x_nchw, weight_oihw, bias):
    """Pure-JAX f32 reference of the same forward pass (for validation)."""
    x_up = jnp.repeat(jnp.repeat(x_nchw, 2, axis=2), 2, axis=3)
    y = jax.lax.conv_general_dilated(
        x_up, weight_oihw,
        window_strides=(1, 1), padding=((1, 1), (1, 1)),
        dimension_numbers=("NCHW", "OIHW", "NCHW"),
        precision=jax.lax.Precision.HIGHEST)
    y = y + bias.reshape(1, -1, 1, 1)
    return jnp.maximum(y, 0.0)


if __name__ == "__main__":
    key = jax.random.PRNGKey(0)
    k_x, k_w, k_b = jax.random.split(key, 3)

    B, in_ch, out_ch, H, W = 2, 4, 8, 16, 16

    x = jax.random.normal(k_x, (B, in_ch, H, W), jnp.float32)
    # Deterministic "kaiming-uniform-ish" init for Conv2d(in_ch, out_ch, 3, 3)
    fan_in = in_ch * 3 * 3
    bound = 1.0 / (fan_in ** 0.5)
    weight = jax.random.uniform(k_w, (out_ch, in_ch, 3, 3), jnp.float32,
                                minval=-bound, maxval=bound)
    bias = jax.random.uniform(k_b, (out_ch,), jnp.float32,
                              minval=-bound, maxval=bound)

    fwd = jax.jit(up_conv_forward)
    out = jax.block_until_ready(fwd(x, weight, bias))
    ref = jax.block_until_ready(_reference(x, weight, bias))

    assert out.shape == (B, out_ch, 2 * H, 2 * W), out.shape
    # Tolerance accounts for bf16 rounding of activations/weights on the MXU
    # (f32 accumulation); structural errors (wrong tap/phase, missing bias/ReLU)
    # are orders of magnitude larger and would still trip this check.
    max_err = float(jnp.max(jnp.abs(out - ref)))
    assert jnp.allclose(out, ref, atol=5e-2, rtol=5e-2), max_err

    print("KERNEL_OK")
</pallas_src>

<mosaic_0001>
module attributes {stable_mosaic.version = 11 : i64} {
  func.func @_up_conv_kernel(%arg0: i32, %arg1: i32, %arg2: memref<1x18x18x4xbf16, #tpu.memory_space<vmem>>, %arg3: memref<32x36xbf16, #tpu.memory_space<vmem>>, %arg4: memref<32x1xf32, #tpu.memory_space<vmem>>, %arg5: memref<1x32x128xf32, #tpu.memory_space<vmem>>) attributes {dimension_semantics = [#tpu.dimension_semantics<parallel>, #tpu.dimension_semantics<parallel>], iteration_bounds = array<i64: 2, 2>, scalar_prefetch = 0 : i64, scratch_operands = 0 : i64, tpu.core_type = #tpu.core_type<tc>, window_params = [{transform_indices = @transform_0, window_bounds = array<i64: 1, 18, 18, 4>}, {pipeline_mode = #tpu.pipeline_mode<synchronous>, transform_indices = @transform_1, window_bounds = array<i64: 32, 36>}, {pipeline_mode = #tpu.pipeline_mode<synchronous>, transform_indices = @transform_2, window_bounds = array<i64: 32, 1>}, {transform_indices = @transform_3, window_bounds = array<i64: 1, 32, 128>}]} {
    %c8_i32 = arith.constant 8 : i32
    %0 = arith.muli %arg1, %c8_i32 : i32
    %c0_i32 = arith.constant 0 : i32
    %1 = arith.addi %0, %c0_i32 : i32
    %c0 = arith.constant 0 : index
    %2 = arith.index_cast %1 : i32 to index
    %c0_0 = arith.constant 0 : index
    %c0_1 = arith.constant 0 : index
    %3 = vector.load %arg2[%c0, %2, %c0_0, %c0_1] : memref<1x18x18x4xbf16, #tpu.memory_space<vmem>>, vector<1x8x16x4xbf16>
    %4 = vector.shape_cast %3 : vector<1x8x16x4xbf16> to vector<8x16x4xbf16>
    %c0_2 = arith.constant 0 : index
    %5 = arith.index_cast %1 : i32 to index
    %c1 = arith.constant 1 : index
    %c0_3 = arith.constant 0 : index
    %6 = vector.load %arg2[%c0_2, %5, %c1, %c0_3] : memref<1x18x18x4xbf16, #tpu.memory_space<vmem>>, vector<1x8x16x4xbf16>
    %7 = vector.shape_cast %6 : vector<1x8x16x4xbf16> to vector<8x16x4xbf16>
    %c0_4 = arith.constant 0 : index
    %8 = arith.index_cast %1 : i32 to index
    %c2 = arith.constant 2 : index
    %c0_5 = arith.constant 0 : index
    %9 = vector.load %arg2[%c0_4, %8, %c2, %c0_5] : memref<1x18x18x4xbf16, #tpu.memory_space<vmem>>, vector<1x8x16x4xbf16>
    %10 = vector.shape_cast %9 : vector<1x8x16x4xbf16> to vector<8x16x4xbf16>
    %c1_i32 = arith.constant 1 : i32
    %11 = arith.addi %0, %c1_i32 : i32
    %c0_6 = arith.constant 0 : index
    %12 = arith.index_cast %11 : i32 to index
    %c0_7 = arith.constant 0 : index
    %c0_8 = arith.constant 0 : index
    %13 = vector.load %arg2[%c0_6, %12, %c0_7, %c0_8] : memref<1x18x18x4xbf16, #tpu.memory_space<vmem>>, vector<1x8x16x4xbf16>
    %14 = vector.shape_cast %13 : vector<1x8x16x4xbf16> to vector<8x16x4xbf16>
    %c0_9 = arith.constant 0 : index
    %15 = arith.index_cast %11 : i32 to index
    %c1_10 = arith.constant 1 : index
    %c0_11 = arith.constant 0 : index
    %16 = vector.load %arg2[%c0_9, %15, %c1_10, %c0_11] : memref<1x18x18x4xbf16, #tpu.memory_space<vmem>>, vector<1x8x16x4xbf16>
    %17 = vector.shape_cast %16 : vector<1x8x16x4xbf16> to vector<8x16x4xbf16>
    %c0_12 = arith.constant 0 : index
    %18 = arith.index_cast %11 : i32 to index
    %c2_13 = arith.constant 2 : index
    %c0_14 = arith.constant 0 : index
    %19 = vector.load %arg2[%c0_12, %18, %c2_13, %c0_14] : memref<1x18x18x4xbf16, #tpu.memory_space<vmem>>, vector<1x8x16x4xbf16>
    %20 = vector.shape_cast %19 : vector<1x8x16x4xbf16> to vector<8x16x4xbf16>
    %c2_i32 = arith.constant 2 : i32
    %21 = arith.addi %0, %c2_i32 : i32
    %c0_15 = arith.constant 0 : index
    %22 = arith.index_cast %21 : i32 to index
    %c0_16 = arith.constant 0 : index
    %c0_17 = arith.constant 0 : index
    %23 = vector.load %arg2[%c0_15, %22, %c0_16, %c0_17] : memref<1x18x18x4xbf16, #tpu.memory_space<vmem>>, vector<1x8x16x4xbf16>
    %24 = vector.shape_cast %23 : vector<1x8x16x4xbf16> to vector<8x16x4xbf16>
    %c0_18 = arith.constant 0 : index
    %25 = arith.index_cast %21 : i32 to index
    %c1_19 = arith.constant 1 : index
    %c0_20 = arith.constant 0 : index
    %26 = vector.load %arg2[%c0_18, %25, %c1_19, %c0_20] : memref<1x18x18x4xbf16, #tpu.memory_space<vmem>>, vector<1x8x16x4xbf16>
    %27 = vector.shape_cast %26 : vector<1x8x16x4xbf16> to vector<8x16x4xbf16>
    %c0_21 = arith.constant 0 : index
    %28 = arith.index_cast %21 : i32 to index
    %c2_22 = arith.constant 2 : index
    %c0_23 = arith.constant 0 : index
    %29 = vector.load %arg2[%c0_21, %28, %c2_22, %c0_23] : memref<1x18x18x4xbf16, #tpu.memory_space<vmem>>, vector<1x8x16x4xbf16>
    %30 = vector.shape_cast %29 : vector<1x8x16x4xbf16> to vector<8x16x4xbf16>
    %31 = tpu.concatenate %4, %7, %10, %14, %17, %20, %24, %27, %30 in 2 : vector<8x16x4xbf16>, vector<8x16x4xbf16>, vector<8x16x4xbf16>, vector<8x16x4xbf16>, vector<8x16x4xbf16>, vector<8x16x4xbf16>, vector<8x16x4xbf16>, vector<8x16x4xbf16>, vector<8x16x4xbf16> -> vector<8x16x36xbf16>
    %32 = vector.shape_cast %31 : vector<8x16x36xbf16> to vector<128x36xbf16>
    %c0_24 = arith.constant 0 : index
    %c0_25 = arith.constant 0 : index
    %33 = vector.load %arg3[%c0_24, %c0_25] : memref<32x36xbf16, #tpu.memory_space<vmem>>, vector<32x36xbf16>
    %cst = arith.constant dense<0.000000e+00> : vector<32x128xf32>
    %34 = tpu.matmul %33, %32, %cst {dimension_numbers = #tpu.dot_dimension_numbers<[1], [1], [0], [0], [0, 0, 1, 0], [], []>} : vector<32x36xbf16>, vector<128x36xbf16>, vector<32x128xf32> -> vector<32x128xf32>
    %c0_26 = arith.constant 0 : index
    %c0_27 = arith.constant 0 : index
    %35 = vector.load %arg4[%c0_26, %c0_27] : memref<32x1xf32, #tpu.memory_space<vmem>>, vector<32x1xf32>
    %36 = vector.broadcast %35 : vector<32x1xf32> to vector<32x128xf32>
    %37 = arith.addf %34, %36 : vector<32x128xf32>
    %cst_28 = arith.constant 0.000000e+00 : f32
    %38 = vector.broadcast %cst_28 : f32 to vector<32x128xf32>
    %39 = arith.maximumf %37, %38 : vector<32x128xf32>
    %c0_29 = arith.constant 0 : index
    %c0_30 = arith.constant 0 : index
    %c0_31 = arith.constant 0 : index
    %40 = vector.load %arg5[%c0_29, %c0_30, %c0_31] : memref<1x32x128xf32, #tpu.memory_space<vmem>>, vector<1x32x128xf32>
    %41 = vector.shape_cast %40 : vector<1x32x128xf32> to vector<32x128xf32>
    %42 = vector.shape_cast %39 : vector<32x128xf32> to vector<1x32x128xf32>
    tpu.vector_store %arg5[%c0_29, %c0_30, %c0_31], %42 {strides = array<i32>} : memref<1x32x128xf32, #tpu.memory_space<vmem>>, vector<1x32x128xf32>,
    return
  }
  func.func @transform_0(%arg0: i32, %arg1: i32) -> (i32, i32, i32, i32) {
    %c0_i32 = arith.constant 0 : i32
    %c0_i32_0 = arith.constant 0 : i32
    %c0_i32_1 = arith.constant 0 : i32
    %c0_i32_2 = arith.constant 0 : i32
    return %arg0, %c0_i32, %c0_i32_0, %c0_i32_1 : i32, i32, i32, i32
  }
  func.func @transform_1(%arg0: i32, %arg1: i32) -> (i32, i32) {
    %c0_i32 = arith.constant 0 : i32
    %c0_i32_0 = arith.constant 0 : i32
    %c0_i32_1 = arith.constant 0 : i32
    return %c0_i32, %c0_i32_0 : i32, i32
  }
  func.func @transform_2(%arg0: i32, %arg1: i32) -> (i32, i32) {
    %c0_i32 = arith.constant 0 : i32
    %c0_i32_0 = arith.constant 0 : i32
    %c0_i32_1 = arith.constant 0 : i32
    return %c0_i32, %c0_i32_0 : i32, i32
  }
  func.func @transform_3(%arg0: i32, %arg1: i32) -> (i32, i32, i32) {
    %c0_i32 = arith.constant 0 : i32
    %c0_i32_0 = arith.constant 0 : i32
    return %arg0, %c0_i32, %arg1 : i32, i32, i32
  }
}

</mosaic_0001>

<bundles_post_ra>
// kernel: tile.0
= control target key start
LH: loop header
LB: loop body
LE: loop exit
PB: predicated region body
PF: predicated region fallthrough
CT: control target
= control target key end

     0   :  { %s66_s8 = smov 125   ;;  %vm7_vm0 = vcmask 7168   ;;  %s67_s11 = smov 126   ;;  %s117_s0 = inlined_call_operand.vmem [shape: f32[4,8], index: 0, kind: input, shape index: {}]   ;;  %s118_s1 = inlined_call_operand.vmem [shape: f32[32,1], index: 1, kind: output, shape index: {}]  }
   0x1   :  { %v4_v0 = vld [vmem:[%s117_s0] sm:$0xf]  ;;  %s65_s0 = smov 127   ;;  %s68_s12 = smov 124  }
   0x2   :  { %5 = vst [vmem:[#allocation0] sm:$0xf] %v4_v0  ;;  %s69_s13 = smov 123   ;;  %s70_s14 = smov 122  }
   0x3   :  { %s71_s15 = smov 121  }
   0x9   :  { %v9_v1 = vld [vmem:[#allocation0] sm:$0xf]  }
   0xa   :  { %v21_v2 = vld [vmem:[#allocation0] sm:$0xf]   ;;  %10 = vrot.lane.b32.xlu0 %v9_v1, %s65_s0 }
   0xb   :  { %22 = vrot.lane.b32.xlu1 %v21_v2, %s66_s8  ;;  %v15_v3 = vld [vmem:[#allocation0] sm:$0xf]  }
   0xc   :  { %v27_v4 = vld [vmem:[#allocation0] sm:$0xf]  }
   0xd   :  { %v6_v5 = vld [vmem:[#allocation0] sm:$0xf]  }
   0xe   :  { %8 = vst.msk [vmem:[%s118_s1] ss:$8 sm:$0xf] %vm7_vm0, %v6_v5   ;;  %16 = vrot.lane.b32.xlu0 %v15_v3, %s67_s11  ;;  %v33_v6 = vld [vmem:[#allocation0] sm:$0xf]  }
   0xf   :  { %28 = vrot.lane.b32.xlu1 %v27_v4, %s68_s12  ;;  %v39_v7 = vld [vmem:[#allocation0] sm:$0xf]  }
  0x10   :  { %v45_v8 = vld [vmem:[#allocation0] sm:$0xf]  }
  0x12   :  { %34 = vrot.lane.b32.xlu0 %v33_v6, %s69_s13 }
  0x13   :  { %40 = vrot.lane.b32.xlu1 %v39_v7, %s70_s14 }
  0x16   :  { %46 = vrot.lane.b32.xlu0 %v45_v8, %s71_s15 }
  0x7c   :  { %v11_v9 = vpop.permute.xlu0 %10  }
  0x7d   :  { %v23_v10 = vpop.permute.xlu1 %22   ;;  %51 = vst.msk [vmem:[%s118_s1 + $0x1] ss:$8 sm:$0xf] %vm7_vm0, %v11_v9  }
  0x7e   :  { %53 = vst.msk [vmem:[%s118_s1 + $0x3] ss:$8 sm:$0xf] %vm7_vm0, %v23_v10  }
  0x80   :  { %v17_v11 = vpop.permute.xlu0 %16  }
  0x81   :  { %v29_v12 = vpop.permute.xlu1 %28   ;;  %52 = vst.msk [vmem:[%s118_s1 + $0x2] ss:$8 sm:$0xf] %vm7_vm0, %v17_v11  }
  0x82   :  { %54 = vst.msk [vmem:[%s118_s1 + $0x4] ss:$8 sm:$0xf] %vm7_vm0, %v29_v12  }
  0x84   :  { %v35_v13 = vpop.permute.xlu0 %34  }
  0x85   :  { %v41_v14 = vpop.permute.xlu1 %40   ;;  %55 = vst.msk [vmem:[%s118_s1 + $0x5] ss:$8 sm:$0xf] %vm7_vm0, %v35_v13  }
  0x86   :  { %56 = vst.msk [vmem:[%s118_s1 + $0x6] ss:$8 sm:$0xf] %vm7_vm0, %v41_v14  }
  0x88   :  { %v47_v15 = vpop.permute.xlu0 %46  }
  0x89   :  { %57 = vst.msk [vmem:[%s118_s1 + $0x7] ss:$8 sm:$0xf] %vm7_vm0, %v47_v15  }

// kernel: tile.8
= control target key start
LH: loop header
LB: loop body
LE: loop exit
PB: predicated region body
PF: predicated region fallthrough
CT: control target
= control target key end

     0   :  { %s22_s0 = inlined_call_operand.vmem [shape: f32[8], index: 0, kind: input, shape index: {}]   ;;  %s23_s1 = inlined_call_operand.vmem [shape: f32[4,8], index: 1, kind: output, shape index: {}]  }
   0x1   :  { %v4_v0 = vld [vmem:[%s22_s0] ss:$0 sm:$0xff] }
   0x2   :  { %5 = vst [vmem:[%s23_s1] sm:$0xf] %v4_v0 }

// kernel: up_conv_forward.1
= control target key start
LH: loop header
LB: loop body
LE: loop exit
PB: predicated region body
PF: predicated region fallthrough
CT: control target
= control target key end

     0   :  { %s1850_s12 = smov 0   ;;  %s1852_s13 = smov 0   ;;  %s2344_s0 = inlined_call_operand.vmem [shape: bf16[2,18,18,4], index: 0, kind: input, shape index: {}]   ;;  %s2345_s1 = inlined_call_operand.vmem [shape: bf16[32,36], index: 1, kind: input, shape index: {}]   ;;  %s2346_s2 = inlined_call_operand.vmem [shape: f32[32,1], index: 2, kind: input, shape index: {}]   ;;  %s2347_s3 = inlined_call_operand.vmem [shape: f32[2,32,256], index: 3, kind: output, shape index: {}]  }
   0x1   :  { %s1854_s14 = smov 0   ;;  %s1856_s15 = smov 0  }
   0x2   :  { %s1858_s16 = smov 0   ;;  %s1860_s17 = smov 0  }
   0x3   :  { %s1862_s18 = smov 0  }
   0x4 LB: > { %s22_s19 = sadd.s32 1, %s1811_s16  ;;  %s25_s20 = sadd.s32 1, %s1815_s17  ;;  %s1819_s18 = sphi %s1862_s18, %s13_s18   ;;  %s1815_s17 = sphi %s1860_s17, %s2354_s17   ;;  %s1811_s16 = sphi %s1858_s16, %s2353_s16   ;;  %s1807_s15 = sphi %s1856_s15, %s2352_s15   ;;  %s1803_s14 = sphi %s1854_s14, %s2351_s14   ;;  %s1799_s13 = sphi %s1852_s13, %s2350_s13   ;;  %s1795_s12 = sphi %s1850_s12, %s2349_s12  }
   0x5   : > { %p23_p0 = scmp.ge.s32.totalorder %s22_s19, 2  ;;  %s1425_s21 = sadd.s32 4294967295, %s1819_s18  }
   0x6   : > { %p112_p1 = scmp.ne.s32.totalorder %s1799_s13, %s1795_s12  ;;  %p113_p2 = scmp.eq.s32.totalorder %s1425_s21, 3 }
   0x7   : > { %s2356_s19 = smov (%p23_p0, %s22_s19), 0  ;;  %s2358_s20 = smov (!%p23_p0, %s25_s20), %s1815_s17 }
   0x8   : > { %s98_s22 = ssub.s32 %s1811_s16, %s2356_s19  ;;  %p27_p3 = scmp.ge.s32.totalorder %s2358_s20, 2 }
   0x9   : > { %p1429_p4 = scmp.ge.s32.totalorder %s1819_s18, 1  ;;  %p1896_p5 = por %p113_p2, %p112_p1 }
   0xa   : > { %p151_p6 = scmp.lt.s32.totalorder %s1819_s18, 5  ;;  %s2360_s20 = smov (%p27_p3, %s2358_s20), 0 }
   0xb   : > { %s97_s24 = ssub.s32 %s1815_s17, %s2360_s20  ;;  %s102_s26 = sadd.s32 1, %s1799_s13 }
   0xc   : > { %p152_p7 = pnand %p1429_p4, %p151_p6  ;;  %s99_s25 = sor.u32 %s98_s22, %s97_s24 }
   0xd   : > { %p100_p8 = scmp.eq.s32.totalorder %s99_s25, 0  ;;  %p174_p9 = scmp.lt.s32.totalorder (!%p152_p7), %s1807_s15, 1  ;;  %vm489_vm0 = vcmask (!%p152_p7), 1046528   ;;  %vm352_vm1 = vsmask.f32 (!%p152_p7), 7424  ;;  %vm1216_vm2 = vcmask (!%p152_p7), 293888  }
   0xe   : > { %155 = sbr.rel (%p152_p7) target bundleno = 511 (0x1ff), region = 32  ;;  %s1821_s8 = smov (!%p152_p7), 12   ;;  %vm1042_vm3 = vcmask (!%p152_p7), 31744   ;;  %vm1059_vm4 = vcmask (!%p152_p7), 64512   ;;  %vm1076_vm5 = vcmask (!%p152_p7), 97280   ;;  %vm1093_vm6 = vcmask (!%p152_p7), 130048  }
   0xf   : > { %s1907_s27 = scalar_select %p100_p8, %s1799_s13, %s102_s26  }
  0x10   : > { %s1584_s29 = smul.u32 (!%p152_p7), 96, %s1803_s14  ;;  %s1822_s9 = smov (!%p152_p7), 8   ;;  %vm1110_vm7 = vcmask (!%p152_p7), 162816   ;;  %vm1127_vm8 = vcmask (!%p152_p7), 195584   ;;  %vm1144_vm9 = vcmask (!%p152_p7), 228352   ;;  %vm1161_vm10 = vcmask (!%p152_p7), 261120  }
  0x11   : > { %s1823_s10 = smov (!%p152_p7), 24   ;;  %s1824_s11 = smov (!%p152_p7), 20  }
  0x12   : > { %s1825_s21 = smov (!%p152_p7), 32   ;;  %s1826_s22 = smov (!%p152_p7), 4  }
  0x13   : > { %s1827_s24 = smov (!%p152_p7), 28   ;;  %s1828_s25 = smov (!%p152_p7), 16  }
  0x15   : > { %s175_s28 = scalar_select %p174_p9, %s1807_s15, 1 }
  0x17   : > { %s1623_s30 = smul.u32 216, %s175_s28 }
  0x19   : > { %s178_s6 = scalar_lea.vmem %s2344_s0, %s1623_s30 }
  0x1a   : > { %s1915_s7 = scalar_lea.vmem %s178_s6, %s1584_s29 }
  0x1b   : > { %v1437_v0 = vld [vmem:[%s1915_s7 + $0xc] sm:$0xf]  ;;  %v1438_v1 = vld [vmem:[%s1915_s7 + $0x10] sm:$0xf]  ;;  %v185_v5 = vld [vmem:[%s1915_s7 + $0x4] sm:$0xf] }
  0x1c   : > { %v1461_v2 = vld [vmem:[%s1915_s7 + $0xc] sm:$0xe]  ;;  %v1920_v3 = vcombine.low %v1437_v0, %v1438_v1  ;;  %v208_v6 = vld [vmem:[%s1915_s7] sm:$0xe]  ;;  %v1471_v12 = vld [vmem:[%s1915_s7 + $0x18] sm:$0xf] }
  0x1d   : > { %v1543_v4 = vcombine.low %v1461_v2, %v1438_v1  ;;  %v1693_v7 = vld [vmem:[%s1915_s7 + $0x8] ss:$0 sps:$4 sm:$0x11]   ;;  %v1519_v8 = vcombine.low %v208_v6, %v185_v5  ;;  %v184_v9 = vld [vmem:[%s1915_s7] sm:$0xf] }
  0x1e   : > { %570 = vrot.lane.b32.xlu1 %v1920_v3, %s1821_s8  ;;  %v613_v10 = vshll.u32 %v1920_v3, 16  ;;  %v1929_v11 = vcombine.low %v184_v9, %v185_v5  ;;  %v1472_v13 = vld [vmem:[%s1915_s7 + $0x1c] sm:$0xf]  ;;  %v491_v16 = vrot.slane %v1693_v7, 1  ;;  %v1495_v17 = vld [vmem:[%s1915_s7 + $0x18] sm:$0xe] }
  0x1f   : > { %v746_v14 = vrot.slane %v1543_v4, 1  ;;  %v490_v15 = vrot.slane %v1519_v8, 1  ;;  %v1551_v18 = vcombine.low %v1471_v12, %v1472_v13  ;;  %v1567_v19 = vcombine.low %v1495_v17, %v1472_v13  ;;  %v1698_v20 = vld [vmem:[%s1915_s7 + $0x14] ss:$0 sps:$4 sm:$0x11]  }
  0x20   : > { %v354_v21 = vshrl.u32 %v1929_v11, 16  ;;  %v1699_v24 = vld [vmem:[%s1915_s7 + $0x20] ss:$0 sps:$4 sm:$0x11]   ;;  %v356_v25 = vshll.u32 %v1929_v11, 16  ;;  %v361_v26 = vshll.u32 %v1693_v7, 16 }
  0x21   : > { %v492_v22 = vsel %vm489_vm0, %v490_v15, %v491_v16  ;;  %v869_v23 = vshll.u32 %v1551_v18, 16  ;;  %v747_v27 = vrot.slane %v1698_v20, 1  ;;  %v1002_v28 = vrot.slane %v1567_v19, 1  ;;  %v187_v29 = vld [vmem:[%s1915_s7 + $0x10] sm:$0xf] }
  0x22   : > { %514 = vrot.lane.b32.xlu0 %v492_v22, %s1822_s9  ;;  %826 = vrot.lane.b32.xlu1 %v1551_v18, %s1823_s10  ;;  %v1003_v30 = vrot.slane %v1699_v24, 1  ;;  %v358_v31 = vrot.slane %v356_v25, 1  ;;  %v363_v32 = vrot.slane %v361_v26, 1  ;;  %v209_v33 = vld [vmem:[%s1915_s7 + $0xc] sm:$0xe]  ;;  %v867_v34 = vshrl.u32 %v1551_v18, 16 }
  0x23   : > { %v748_v35 = vsel %vm489_vm0, %v746_v14, %v747_v27  ;;  %v1700_v36 = vld [vmem:[%s1915_s7 + $0x14] ss:$0 sps:$4 sm:$0x11]   ;;  %v1520_v37 = vcombine.low %v209_v33, %v187_v29  ;;  %v186_v38 = vld [vmem:[%s1915_s7 + $0xc] sm:$0xf]  ;;  %v871_v39 = vrot.slane %v869_v23, 1 }
  0x24   : > { %v1004_v40 = vsel %vm489_vm0, %v1002_v28, %v1003_v30  ;;  %v359_v41 = vor.u32 %v358_v31, %v354_v21  ;;  %v1947_v42 = vcombine.low %v186_v38, %v187_v29  ;;  %v874_v43 = vshll.u32 %v1699_v24, 16  ;;  %v1439_v44 = vld [vmem:[%s1915_s7 + $0x18] sm:$0xf]  ;;  %v1440_v49 = vld [vmem:[%s1915_s7 + $0x1c] sm:$0xf] }
  0x25   : > { %v493_v45 = vrot.slane %v1520_v37, 1  ;;  %v494_v46 = vrot.slane %v1700_v36, 1  ;;  %v872_v47 = vor.u32 %v871_v39, %v867_v34  ;;  %v611_v48 = vshrl.u32 %v1920_v3, 16  ;;  %v1462_v54 = vld [vmem:[%s1915_s7 + $0x18] sm:$0xe] }
  0x26   : > { %770 = vrot.lane.b32.xlu0 %v748_v35, %s1824_s11  ;;  %1026 = vrot.lane.b32.xlu1 %v1004_v40, %s1825_s21  ;;  %v364_v50 = vsel %vm352_vm1, %v359_v41, %v363_v32  ;;  %v876_v51 = vrot.slane %v874_v43, 1  ;;  %v615_v52 = vrot.slane %v613_v10, 1  ;;  %v618_v53 = vshll.u32 %v1698_v20, 16  ;;  %v1705_v59 = vld [vmem:[%s1915_s7 + $0x20] ss:$0 sps:$4 sm:$0x11]  }
  0x27   : > { %v495_v55 = vsel %vm489_vm0, %v493_v45, %v494_v46  ;;  %v366_v56 = vshrl.u32 %v1947_v42, 16  ;;  %v368_v57 = vshll.u32 %v1947_v42, 16  ;;  %v373_v58 = vshll.u32 %v1700_v36, 16  ;;  %v1473_v63 = vld [vmem:[%s1915_s7 + $0x24] sm:$0xf] }
  0x28   : > { %v616_v60 = vor.u32 %v615_v52, %v611_v48  ;;  %v620_v61 = vrot.slane %v618_v53, 1  ;;  %v1528_v62 = vcombine.low %v1439_v44, %v1440_v49  ;;  %v1474_v0 = vld [vmem:[%s1915_s7 + $0x28] sm:$0xf]  ;;  %v630_v3 = vshll.u32 %v1705_v59, 16  ;;  %v1496_v8 = vld [vmem:[%s1915_s7 + $0x24] sm:$0xe] }
  0x29   : > { %v370_v1 = vrot.slane %v368_v57, 1  ;;  %v375_v2 = vrot.slane %v373_v58, 1  ;;  %v877_v4 = vsel %vm352_vm1, %v872_v47, %v876_v51  ;;  %v1544_v10 = vcombine.low %v1462_v54, %v1440_v49  ;;  %v1708_v13 = vld [vmem:[%s1915_s7 + $0x2c] ss:$0 sps:$4 sm:$0x11]  }
  0x2a   : > { %449 = vrot.lane.b32.xlu0 %v364_v50, %s1826_s22  ;;  %516 = vrot.lane.b32.xlu1 %v495_v55, %s1822_s9  ;;  %v621_v5 = vsel %vm352_vm1, %v616_v60, %v620_v61  ;;  %v625_v6 = vshll.u32 %v1528_v62, 16  ;;  %v623_v7 = vshrl.u32 %v1528_v62, 16  ;;  %v1552_v12 = vcombine.low %v1473_v63, %v1474_v0  ;;  %v188_v16 = vld [vmem:[%s1915_s7 + $0x18] sm:$0xf]  ;;  %v189_v17 = vld [vmem:[%s1915_s7 + $0x1c] sm:$0xf] }
  0x2b   : > { %v371_v9 = vor.u32 %v370_v1, %v366_v56  ;;  %v632_v15 = vrot.slane %v630_v3, 1  ;;  %v1568_v19 = vcombine.low %v1496_v8, %v1474_v0  ;;  %v750_v22 = vrot.slane %v1705_v59, 1  ;;  %v210_v23 = vld [vmem:[%s1915_s7 + $0x18] sm:$0xe]  ;;  %v1441_v27 = vld [vmem:[%s1915_s7 + $0x24] sm:$0xf] }
  0x2c   : > { %v627_v14 = vrot.slane %v625_v6, 1  ;;  %v881_v18 = vshll.u32 %v1552_v12, 16  ;;  %v749_v24 = vrot.slane %v1544_v10, 1  ;;  %v879_v25 = vshrl.u32 %v1552_v12, 16  ;;  %v1442_v28 = vld [vmem:[%s1915_s7 + $0x28] sm:$0xf] }
  0x2d   : > { %v376_v20 = vsel %vm352_vm1, %v371_v9, %v375_v2  ;;  %v1974_v26 = vcombine.low %v188_v16, %v189_v17  ;;  %v886_v30 = vshll.u32 %v1708_v13, 16  ;;  %v1710_v31 = vld [vmem:[%s1915_s7 + $0x20] ss:$0 sps:$4 sm:$0x11]   ;;  %v1005_v33 = vrot.slane %v1568_v19, 1 }
  0x2e   : > { %962 = vrot.lane.b32.xlu0 %v877_v4, %s1827_s24  ;;  %706 = vrot.lane.b32.xlu1 %v621_v5, %s1828_s25  ;;  %v628_v21 = vor.u32 %v627_v14, %v623_v7  ;;  %v883_v32 = vrot.slane %v881_v18, 1  ;;  %v1006_v34 = vrot.slane %v1708_v13, 1  ;;  %v1521_v35 = vcombine.low %v210_v23, %v189_v17  ;;  %v1714_v38 = vld [vmem:[%s1915_s7 + $0x2c] ss:$0 sps:$4 sm:$0x11]  }
  0x2f   : > { %v380_v36 = vshll.u32 %v1974_v26, 16  ;;  %v1983_v37 = vcombine.low %v1441_v27, %v1442_v28  ;;  %v751_v39 = vsel %vm489_vm0, %v749_v24, %v750_v22  ;;  %v888_v40 = vrot.slane %v886_v30, 1  ;;  %v1475_v49 = vld [vmem:[%s1915_s7 + $0x30] sm:$0xf]  ;;  %v1476_v50 = vld [vmem:[%s1915_s7 + $0x34] sm:$0xf] }
  0x30   : > { %v633_v29 = vsel %vm352_vm1, %v628_v21, %v632_v15  ;;  %v378_v41 = vshrl.u32 %v1974_v26, 16  ;;  %v385_v43 = vshll.u32 %v1710_v31, 16  ;;  %v884_v45 = vor.u32 %v883_v32, %v879_v25  ;;  %v1463_v57 = vld [vmem:[%s1915_s7 + $0x24] sm:$0xe]  ;;  %v1497_v58 = vld [vmem:[%s1915_s7 + $0x30] sm:$0xe] }
  0x31   : > { %v637_v44 = vshll.u32 %v1983_v37, 16  ;;  %v1007_v46 = vsel %vm489_vm0, %v1005_v33, %v1006_v34  ;;  %v496_v47 = vrot.slane %v1521_v35, 1  ;;  %v497_v48 = vrot.slane %v1710_v31, 1  ;;  %v190_v0 = vld [vmem:[%s1915_s7 + $0x24] sm:$0xf] }
  0x32   : > { %451 = vrot.lane.b32.xlu0 %v376_v20, %s1826_s22  ;;  %708 = vrot.lane.b32.xlu1 %v633_v29, %s1828_s25  ;;  %v382_v51 = vrot.slane %v380_v36, 1  ;;  %v635_v52 = vshrl.u32 %v1983_v37, 16  ;;  %v642_v54 = vshll.u32 %v1714_v38, 16  ;;  %v889_v55 = vsel %vm352_vm1, %v884_v45, %v888_v40  ;;  %v191_v1 = vld [vmem:[%s1915_s7 + $0x28] sm:$0xf] }
  0x33   : > { %v639_v53 = vrot.slane %v637_v44, 1  ;;  %v387_v56 = vrot.slane %v385_v43, 1  ;;  %v1553_v59 = vcombine.low %v1475_v49, %v1476_v50  ;;  %v498_v61 = vsel %vm489_vm0, %v496_v47, %v497_v48  ;;  %v1443_v2 = vld [vmem:[%s1915_s7 + $0x30] sm:$0xf]  ;;  %v2005_v3 = vld [vmem:[%s1915_s7 + $0x34] sm:$0xf] }
  0x34   : > { %v383_v60 = vor.u32 %v382_v51, %v378_v41  ;;  %v644_v63 = vrot.slane %v642_v54, 1  ;;  %v1545_v4 = vcombine.low %v1463_v57, %v1442_v28  ;;  %v1569_v5 = vcombine.low %v1497_v58, %v1476_v50  ;;  %v1717_v6 = vld [vmem:[%s1915_s7 + $0x38] ss:$0 sps:$4 sm:$0x11]   ;;  %v1477_v35 = vld [vmem:[%s1915_s7 + $0x3c] sm:$0xf] }
  0x35   : > { %v893_v7 = vshll.u32 %v1553_v59, 16  ;;  %v2012_v10 = vcombine.low %v190_v0, %v191_v1  ;;  %v2016_v13 = vcombine.low %v1443_v2, %v2005_v3  ;;  %v753_v14 = vrot.slane %v1714_v38, 1  ;;  %v1719_v15 = vld [vmem:[%s1915_s7 + $0x2c] ss:$0 sps:$4 sm:$0x11]  }
  0x36   : > { %572 = vrot.lane.b32.xlu0 %v1528_v62, %s1821_s8  ;;  %828 = vrot.lane.b32.xlu1 %v1552_v12, %s1823_s10  ;;  %v640_v62 = vor.u32 %v639_v53, %v635_v52  ;;  %v388_v8 = vsel %vm352_vm1, %v383_v60, %v387_v56  ;;  %v211_v12 = vld [vmem:[%s1915_s7 + $0x24] sm:$0xe]  ;;  %v752_v16 = vrot.slane %v1545_v4, 1  ;;  %v898_v17 = vshll.u32 %v1717_v6, 16  ;;  %v1478_v41 = vld [vmem:[%s1915_s7 + $0x40] sm:$0xf] }
  0x37   : > { %v1008_v18 = vrot.slane %v1569_v5, 1  ;;  %v1009_v19 = vrot.slane %v1717_v6, 1  ;;  %v891_v20 = vshrl.u32 %v1553_v59, 16  ;;  %v895_v21 = vrot.slane %v893_v7, 1  ;;  %v1498_v45 = vld [vmem:[%s1915_s7 + $0x3c] sm:$0xe] }
  0x38   : > { %v645_v9 = vsel %vm352_vm1, %v640_v62, %v644_v63  ;;  %v1522_v22 = vcombine.low %v211_v12, %v191_v1  ;;  %v392_v23 = vshll.u32 %v2012_v10, 16  ;;  %v649_v24 = vshll.u32 %v2016_v13, 16  ;;  %v1723_v25 = vld [vmem:[%s1915_s7 + $0x38] ss:$0 sps:$4 sm:$0x11]  }
  0x39   : > { %v754_v27 = vsel %vm489_vm0, %v752_v16, %v753_v14  ;;  %v900_v28 = vrot.slane %v898_v17, 1  ;;  %v1010_v29 = vsel %vm489_vm0, %v1008_v18, %v1009_v19  ;;  %v397_v30 = vshll.u32 %v1719_v15, 16  ;;  %v192_v51 = vld [vmem:[%s1915_s7 + $0x30] sm:$0xf]  ;;  %v193_v53 = vld [vmem:[%s1915_s7 + $0x34] sm:$0xf] }
  0x3a   : > { %772 = vrot.lane.b32.xlu0 %v751_v39, %s1824_s11  ;;  %1028 = vrot.lane.b32.xlu1 %v1007_v46, %s1825_s21  ;;  %v896_v31 = vor.u32 %v895_v21, %v891_v20  ;;  %v390_v32 = vshrl.u32 %v2012_v10, 16  ;;  %v499_v33 = vrot.slane %v1522_v22, 1  ;;  %v500_v34 = vrot.slane %v1719_v15, 1  ;;  %v1445_v54 = vld [vmem:[%s1915_s7 + $0x3c] sm:$0xf] }
  0x3b   : > { %v394_v36 = vrot.slane %v392_v23, 1  ;;  %v647_v38 = vshrl.u32 %v2016_v13, 16  ;;  %v651_v39 = vrot.slane %v649_v24, 1  ;;  %v654_v40 = vshll.u32 %v1723_v25, 16  ;;  %v212_v62 = vld [vmem:[%s1915_s7 + $0x30] sm:$0xe] }
  0x3c   : > { %v901_v43 = vsel %vm352_vm1, %v896_v31, %v900_v28  ;;  %v399_v44 = vrot.slane %v397_v30, 1  ;;  %v1554_v46 = vcombine.low %v1477_v35, %v1478_v41  ;;  %v501_v48 = vsel %vm489_vm0, %v499_v33, %v500_v34  ;;  %v1726_v57 = vld [vmem:[%s1915_s7 + $0x44] ss:$0 sps:$4 sm:$0x11]   ;;  %v1479_v23 = vld [vmem:[%s1915_s7 + $0x48] sm:$0xf] }
  0x3d   : > { %v395_v47 = vor.u32 %v394_v36, %v390_v32  ;;  %v652_v49 = vor.u32 %v651_v39, %v647_v38  ;;  %v656_v50 = vrot.slane %v654_v40, 1  ;;  %v1570_v56 = vcombine.low %v1498_v45, %v1478_v41  ;;  %v1728_v7 = vld [vmem:[%s1915_s7 + $0x38] ss:$0 sps:$4 sm:$0x11]   ;;  %v1465_v30 = vld [vmem:[%s1915_s7 + $0x3c] sm:$0xe] }
  0x3e   : > { %964 = vrot.lane.b32.xlu0 %v889_v55, %s1827_s24  ;;  %518 = vrot.lane.b32.xlu1 %v498_v61, %s1822_s9  ;;  %v2044_v55 = vld [vmem:[%s1915_s7 + $0x40] sm:$0xf]  ;;  %v905_v58 = vshll.u32 %v1554_v46, 16  ;;  %v2051_v61 = vcombine.low %v192_v51, %v193_v53  ;;  %v756_v1 = vrot.slane %v1723_v25, 1  ;;  %v903_v2 = vshrl.u32 %v1554_v46, 16 }
  0x3f   : > { %v657_v60 = vsel %vm352_vm1, %v652_v49, %v656_v50  ;;  %v2055_v63 = vcombine.low %v1445_v54, %v2044_v55  ;;  %v1011_v4 = vrot.slane %v1570_v56, 1  ;;  %v1012_v5 = vrot.slane %v1726_v57, 1  ;;  %v1732_v14 = vld [vmem:[%s1915_s7 + $0x44] ss:$0 sps:$4 sm:$0x11]  }
  0x40   : > { %v907_v6 = vrot.slane %v905_v58, 1  ;;  %v402_v18 = vshrl.u32 %v2051_v61, 16  ;;  %v409_v20 = vshll.u32 %v1728_v7, 16  ;;  %v503_v22 = vrot.slane %v1728_v7, 1  ;;  %v1499_v32 = vld [vmem:[%s1915_s7 + $0x48] sm:$0xe] }
  0x41   : > { %v661_v12 = vshll.u32 %v2055_v63, 16  ;;  %v1013_v17 = vsel %vm489_vm0, %v1011_v4, %v1012_v5  ;;  %v659_v25 = vshrl.u32 %v2055_v63, 16  ;;  %v666_v28 = vshll.u32 %v1732_v14, 16  ;;  %v194_v39 = vld [vmem:[%s1915_s7 + $0x3c] sm:$0xf] }
  0x42   : > { %453 = vrot.lane.b32.xlu0 %v388_v8, %s1826_s22  ;;  %710 = vrot.lane.b32.xlu1 %v645_v9, %s1828_s25  ;;  %v1523_v8 = vcombine.low %v212_v62, %v193_v53  ;;  %v404_v9 = vshll.u32 %v2051_v61, 16  ;;  %v908_v19 = vor.u32 %v907_v6, %v903_v2  ;;  %v411_v31 = vrot.slane %v409_v20, 1  ;;  %v195_v40 = vld [vmem:[%s1915_s7 + $0x40] sm:$0xf]  ;;  %v213_v50 = vld [vmem:[%s1915_s7 + $0x3c] sm:$0xe] }
  0x43   : > { %v668_v38 = vrot.slane %v666_v28, 1  ;;  %v1547_v41 = vcombine.low %v1465_v30, %v2044_v55  ;;  %v1735_v45 = vld [vmem:[%s1915_s7 + $0x50] ss:$0 sps:$4 sm:$0x11]   ;;  %v2090_v49 = vcombine.low %v194_v39, %v195_v40  ;;  %v759_v53 = vrot.slane %v1732_v14, 1 }
  0x44   : > { %v502_v21 = vrot.slane %v1523_v8, 1  ;;  %v406_v24 = vrot.slane %v404_v9, 1  ;;  %v922_v54 = vshll.u32 %v1735_v45, 16  ;;  %v1015_v56 = vrot.slane %v1735_v45, 1  ;;  %v196_v28 = vld [vmem:[%s1915_s7 + $0x48] sm:$0xf] }
  0x45   : > { %v416_v62 = vshll.u32 %v2090_v49, 16  ;;  %v414_v7 = vshrl.u32 %v2090_v49, 16  ;;  %v197_v30 = vld [vmem:[%s1915_s7 + $0x4c] sm:$0xf]  ;;  %v214_v39 = vld [vmem:[%s1915_s7 + $0x48] sm:$0xe] }
  0x46   : > { %574 = vrot.lane.b32.xlu0 %v1983_v37, %s1821_s8  ;;  %830 = vrot.lane.b32.xlu1 %v1553_v59, %s1823_s10  ;;  %v1464_v37 = vld [vmem:[%s1915_s7 + $0x30] sm:$0xe]  ;;  %v400_v59 = vsel %vm352_vm1, %v395_v47, %v399_v44  ;;  %v407_v34 = vor.u32 %v406_v24, %v402_v18  ;;  %v504_v35 = vsel %vm489_vm0, %v502_v21, %v503_v22  ;;  %v1482_v18 = vld [vmem:[%s1915_s7 + $0x58] sm:$0xf] }
  0x47   : > { %v1546_v52 = vcombine.low %v1464_v37, %v2005_v3  ;;  %v910_v3 = vshll.u32 %v1726_v57, 16  ;;  %v1447_v37 = vld [vmem:[%s1915_s7 + $0x48] sm:$0xf]  ;;  %v1737_v57 = vld [vmem:[%s1915_s7 + $0x44] ss:$0 sps:$4 sm:$0x11]  }
  0x48   : > { %v412_v47 = vsel %vm352_vm1, %v407_v34, %v411_v31  ;;  %v421_v5 = vshll.u32 %v1737_v57, 16  ;;  %v506_v9 = vrot.slane %v1737_v57, 1  ;;  %v418_v14 = vrot.slane %v416_v62, 1  ;;  %v1500_v21 = vld [vmem:[%s1915_s7 + $0x54] sm:$0xe] }
  0x49   : > { %v755_v0 = vrot.slane %v1546_v52, 1  ;;  %v912_v16 = vrot.slane %v910_v3, 1  ;;  %v758_v52 = vrot.slane %v1547_v41, 1  ;;  %v924_v3 = vrot.slane %v922_v54, 1  ;;  %v2122_v31 = vld [vmem:[%s1915_s7 + $0x58] sm:$0xf] }
  0x4a   : > { %774 = vrot.lane.b32.xlu0 %v754_v27, %s1824_s11  ;;  %1030 = vrot.lane.b32.xlu1 %v1010_v29, %s1825_s21  ;;  %v663_v27 = vrot.slane %v661_v12, 1  ;;  %v1480_v29 = vld [vmem:[%s1915_s7 + $0x4c] sm:$0xf]  ;;  %v1481_v12 = vld [vmem:[%s1915_s7 + $0x54] sm:$0xf]  ;;  %v423_v20 = vrot.slane %v421_v5, 1 }
  0x4b   : > { %v757_v15 = vsel %vm489_vm0, %v755_v0, %v756_v1  ;;  %v1555_v33 = vcombine.low %v1479_v23, %v1480_v29  ;;  %v1571_v44 = vcombine.low %v1499_v32, %v1480_v29  ;;  %v1741_v1 = vld [vmem:[%s1915_s7 + $0x50] ss:$0 sps:$4 sm:$0x11]   ;;  %v760_v2 = vsel %vm489_vm0, %v758_v52, %v759_v53  ;;  %v1750_v54 = vld [vmem:[%s1915_s7 + $0x5c] ss:$0 sps:$4 sm:$0x11]  }
  0x4c   : > { %v664_v36 = vor.u32 %v663_v27, %v659_v25  ;;  %v1556_v22 = vcombine.low %v1481_v12, %v1482_v18  ;;  %v419_v23 = vor.u32 %v418_v14, %v414_v7  ;;  %v1572_v32 = vcombine.low %v1500_v21, %v1482_v18  ;;  %v198_v18 = vld [vmem:[%s1915_s7 + $0x54] sm:$0xf]  ;;  %v2161_v21 = vld [vmem:[%s1915_s7 + $0x64] sm:$0xf] }
  0x4d   : > { %v1014_v55 = vrot.slane %v1571_v44, 1  ;;  %v915_v58 = vshrl.u32 %v1555_v33, 16  ;;  %v690_v5 = vshll.u32 %v1750_v54, 16 }
  0x4e   : > { %966 = vrot.lane.b32.xlu0 %v901_v43, %s1827_s24  ;;  %520 = vrot.lane.b32.xlu1 %v501_v48, %s1822_s9  ;;  %v2083_v43 = vld [vmem:[%s1915_s7 + $0x4c] sm:$0xf]  ;;  %v669_v48 = vsel %vm352_vm1, %v664_v36, %v668_v38  ;;  %v929_v34 = vshll.u32 %v1556_v22, 16  ;;  %v2129_v38 = vcombine.low %v196_v28, %v197_v30  ;;  %v1017_v44 = vrot.slane %v1572_v32, 1 }
  0x4f   : > { %v2094_v51 = vcombine.low %v1447_v37, %v2083_v43  ;;  %v1016_v4 = vsel %vm489_vm0, %v1014_v55, %v1015_v56  ;;  %v762_v37 = vrot.slane %v1741_v1, 1 }
  0x50   : > { %v428_v52 = vshll.u32 %v2129_v38, 16 }
  0x51   : > { %v673_v0 = vshll.u32 %v2094_v51, 16 }
  0x52   : > { %455 = vrot.lane.b32.xlu0 %v400_v59, %s1826_s22  ;;  %712 = vrot.lane.b32.xlu1 %v657_v60, %s1828_s25  ;;  %v1524_v60 = vcombine.low %v213_v50, %v195_v40  ;;  %v1525_v50 = vcombine.low %v214_v39, %v197_v30 }
  0x54   : > { %v505_v8 = vrot.slane %v1524_v60, 1  ;;  %v426_v60 = vshrl.u32 %v2129_v38, 16  ;;  %v508_v62 = vrot.slane %v1525_v50, 1 }
  0x56   : > { %576 = vrot.lane.b32.xlu0 %v2016_v13, %s1821_s8  ;;  %832 = vrot.lane.b32.xlu1 %v1554_v46, %s1823_s10  ;;  %v913_v13 = vsel %vm352_vm1, %v908_v19, %v912_v16  ;;  %v917_v46 = vshll.u32 %v1555_v33, 16  ;;  %v675_v16 = vrot.slane %v673_v0, 1  ;;  %v507_v24 = vsel %vm489_vm0, %v505_v8, %v506_v9  ;;  %v1501_v9 = vld [vmem:[%s1915_s7 + $0x60] sm:$0xe] }
  0x58   : > { %v919_v59 = vrot.slane %v917_v46, 1  ;;  %v1746_v46 = vld [vmem:[%s1915_s7 + $0x50] ss:$0 sps:$4 sm:$0x11]  }
  0x59   : > { %v509_v0 = vrot.slane %v1746_v46, 1 }
  0x5a   : > { %776 = vrot.lane.b32.xlu0 %v757_v15, %s1824_s11  ;;  %1032 = vrot.lane.b32.xlu1 %v1013_v17, %s1825_s21  ;;  %v920_v6 = vor.u32 %v919_v59, %v915_v58  ;;  %v671_v15 = vshrl.u32 %v2094_v51, 16  ;;  %v678_v17 = vshll.u32 %v1741_v1, 16  ;;  %v433_v58 = vshll.u32 %v1746_v46, 16  ;;  %v1483_v1 = vld [vmem:[%s1915_s7 + $0x60] sm:$0xf] }
  0x5c   : > { %v925_v19 = vsel %vm352_vm1, %v920_v6, %v924_v3  ;;  %v676_v25 = vor.u32 %v675_v16, %v671_v15  ;;  %v680_v27 = vrot.slane %v678_v17, 1  ;;  %v1484_v6 = vld [vmem:[%s1915_s7 + $0x64] sm:$0xf]  ;;  %v435_v8 = vrot.slane %v433_v58, 1 }
  0x5d   : > { %v1557_v12 = vcombine.low %v1483_v1, %v1484_v6  ;;  %v510_v15 = vsel %vm489_vm0, %v508_v62, %v509_v0  ;;  %v692_v17 = vrot.slane %v690_v5, 1 }
  0x5e   : > { %968 = vrot.lane.b32.xlu0 %v913_v13, %s1827_s24  ;;  %522 = vrot.lane.b32.xlu1 %v504_v35, %s1822_s9  ;;  %v1449_v13 = vld [vmem:[%s1915_s7 + $0x54] sm:$0xf]  ;;  %v424_v35 = vsel %vm352_vm1, %v419_v23, %v423_v20  ;;  %v681_v36 = vsel %vm352_vm1, %v676_v25, %v680_v27  ;;  %v1451_v20 = vld [vmem:[%s1915_s7 + $0x60] sm:$0xf] }
  0x5f   : > { %v2133_v40 = vcombine.low %v1449_v13, %v2122_v31  ;;  %v1753_v23 = vld [vmem:[%s1915_s7 + $0x68] ss:$0 sps:$4 sm:$0x11]   ;;  %v1534_v30 = vcombine.low %v1451_v20, %v2161_v21 }
  0x60   : > { %v946_v32 = vshll.u32 %v1753_v23, 16 }
  0x61   : > { %v685_v53 = vshll.u32 %v2133_v40, 16  ;;  %v683_v3 = vshrl.u32 %v2133_v40, 16 }
  0x62   : > { %457 = vrot.lane.b32.xlu0 %v412_v47, %s1826_s22  ;;  %714 = vrot.lane.b32.xlu1 %v669_v48, %s1828_s25  ;;  %v927_v47 = vshrl.u32 %v1556_v22, 16  ;;  %v931_v48 = vrot.slane %v929_v34, 1  ;;  %v1021_v34 = vrot.slane %v1753_v23, 1  ;;  %v948_v46 = vrot.slane %v946_v32, 1 }
  0x64   : > { %v932_v59 = vor.u32 %v931_v48, %v927_v47 }
  0x66   : > { %578 = vrot.lane.b32.xlu0 %v2055_v63, %s1821_s8  ;;  %834 = vrot.lane.b32.xlu1 %v1555_v33, %s1823_s10  ;;  %v1466_v63 = vld [vmem:[%s1915_s7 + $0x48] sm:$0xe]  ;;  %v1744_v33 = vld [vmem:[%s1915_s7 + $0x5c] ss:$0 sps:$4 sm:$0x11]  }
  0x67   : > { %v1548_v29 = vcombine.low %v1466_v63, %v2083_v43  ;;  %v934_v43 = vshll.u32 %v1744_v33, 16  ;;  %v1018_v45 = vrot.slane %v1744_v33, 1 }
  0x69   : > { %v761_v41 = vrot.slane %v1548_v29, 1  ;;  %v936_v56 = vrot.slane %v934_v43, 1  ;;  %v1019_v57 = vsel %vm489_vm0, %v1017_v44, %v1018_v45  ;;  %v215_v29 = vld [vmem:[%s1915_s7 + $0x54] sm:$0xe]  ;;  %v697_v43 = vshll.u32 %v1534_v30, 16 }
  0x6a   : > { %778 = vrot.lane.b32.xlu0 %v760_v2, %s1824_s11  ;;  %1034 = vrot.lane.b32.xlu1 %v1016_v4, %s1825_s21  ;;  %v430_v2 = vrot.slane %v428_v52, 1  ;;  %v687_v4 = vrot.slane %v685_v53, 1  ;;  %v1759_v44 = vld [vmem:[%s1915_s7 + $0x68] ss:$0 sps:$4 sm:$0x11]  }
  0x6b   : > { %v763_v55 = vsel %vm489_vm0, %v761_v41, %v762_v37  ;;  %v937_v7 = vsel %vm352_vm1, %v932_v59, %v936_v56  ;;  %v695_v56 = vshrl.u32 %v1534_v30, 16  ;;  %v702_v58 = vshll.u32 %v1759_v44, 16  ;;  %v1485_v59 = vld [vmem:[%s1915_s7 + $0x6c] sm:$0xf] }
  0x6c   : > { %v431_v14 = vor.u32 %v430_v2, %v426_v60  ;;  %v688_v16 = vor.u32 %v687_v4, %v683_v3  ;;  %v1486_v60 = vld [vmem:[%s1915_s7 + $0x70] sm:$0xf]  ;;  %v1468_v2 = vld [vmem:[%s1915_s7 + $0x60] sm:$0xe] }
  0x6d   : > { %v704_v4 = vrot.slane %v702_v58, 1  ;;  %v1558_v5 = vcombine.low %v1485_v59, %v1486_v60 }
  0x6e   : > { %970 = vrot.lane.b32.xlu0 %v925_v19, %s1827_s24  ;;  %524 = vrot.lane.b32.xlu1 %v507_v24, %s1822_s9  ;;  %v199_v19 = vld [vmem:[%s1915_s7 + $0x58] sm:$0xf]  ;;  %v941_v24 = vshll.u32 %v1557_v12, 16  ;;  %v436_v25 = vsel %vm352_vm1, %v431_v14, %v435_v8  ;;  %v693_v27 = vsel %vm352_vm1, %v688_v16, %v692_v17  ;;  %v768_v17 = vrot.slane %v1759_v44, 1 }
  0x6f   : > { %v2168_v28 = vcombine.low %v198_v18, %v199_v19  ;;  %v1526_v41 = vcombine.low %v215_v29, %v199_v19 }
  0x70   : > { %v943_v39 = vrot.slane %v941_v24, 1  ;;  %v1763_v24 = vld [vmem:[%s2345_s1] sm:$0xff]  }
  0x71   : > { %v440_v37 = vshll.u32 %v2168_v28, 16  ;;  %v438_v52 = vshrl.u32 %v2168_v28, 16  ;;  %v511_v53 = vrot.slane %v1526_v41, 1  ;;  %1611 = vmatprep.mubr.msk.bf16.mxu0 %vm1216_vm2, %v1763_v24 }
  0x72   : > { %459 = vrot.lane.b32.xlu0 %v424_v35, %s1826_s22  ;;  %716 = vrot.lane.b32.xlu1 %v681_v36, %s1828_s25  ;;  %v1755_v35 = vld [vmem:[%s1915_s7 + $0x5c] ss:$0 sps:$4 sm:$0x11]   ;;  %v939_v36 = vshrl.u32 %v1557_v12, 16 }
  0x73   : > { %v445_v48 = vshll.u32 %v1755_v35, 16 }
  0x74   : > { %v944_v50 = vor.u32 %v943_v39, %v939_v36  ;;  %v1829_v36 = vmov 0  }
  0x75   : > { %v447_v62 = vrot.slane %v445_v48, 1  ;;  %1690 = vset.pattern.permute.xlu1 %v1829_v36  ;;  %1689 = vset.pattern.permute.xlu0 %v1829_v36 }
  0x76   : > { %580 = vrot.lane.b32.xlu0 %v2094_v51, %s1821_s8  ;;  %836 = vrot.lane.b32.xlu1 %v1556_v22, %s1823_s10  ;;  %v1467_v51 = vld [vmem:[%s1915_s7 + $0x54] sm:$0xe]  ;;  %v1573_v22 = vcombine.low %v1501_v9, %v1484_v6  ;;  %v1502_v6 = vld [vmem:[%s1915_s7 + $0x6c] sm:$0xe] }
  0x77   : > { %v1549_v63 = vcombine.low %v1467_v51, %v2122_v31  ;;  %v765_v31 = vrot.slane %v1750_v54, 1  ;;  %v512_v54 = vrot.slane %v1755_v35, 1  ;;  %v1550_v51 = vcombine.low %v1468_v2, %v2161_v21 }
  0x78   : > { %v1020_v33 = vrot.slane %v1573_v22, 1  ;;  %v1574_v14 = vcombine.low %v1502_v6, %v1486_v60 }
  0x79   : > { %v764_v13 = vrot.slane %v1549_v63, 1  ;;  %v513_v0 = vsel %vm489_vm0, %v511_v53, %v512_v54  ;;  %v767_v16 = vrot.slane %v1550_v51, 1  ;;  %v951_v63 = vshrl.u32 %v1558_v5, 16 }
  0x7a   : > { %780 = vrot.lane.b32.xlu0 %v763_v55, %s1824_s11  ;;  %1036 = vrot.lane.b32.xlu1 %v1019_v57, %s1825_s21  ;;  %v1022_v47 = vsel %vm489_vm0, %v1020_v33, %v1021_v34  ;;  %v442_v55 = vrot.slane %v440_v37, 1  ;;  %v699_v57 = vrot.slane %v697_v43, 1  ;;  %v1023_v20 = vrot.slane %v1574_v14, 1  ;;  %v1183_v33 = vld [vmem:[%s2346_s2 + $0x8] sm:$0xff]  ;;  %v1182_v37 = vld [vmem:[%s2346_s2] sm:$0xff] }
  0x7b   : > { %v766_v45 = vsel %vm489_vm0, %v764_v13, %v765_v31  ;;  %v1184_v43 = vld [vmem:[%s2346_s2 + $0x10] sm:$0xff] }
  0x7c   : > { %v443_v1 = vor.u32 %v442_v55, %v438_v52  ;;  %v700_v3 = vor.u32 %v699_v57, %v695_v56 }
  0x7e   : > { %972 = vrot.lane.b32.xlu0 %v937_v7, %s1827_s24  ;;  %526 = vrot.lane.b32.xlu1 %v510_v15, %s1822_s9  ;;  %v1762_v7 = vld [vmem:[%s1915_s7 + $0x74] ss:$0 sps:$4 sm:$0x11]   ;;  %v448_v8 = vsel %vm352_vm1, %v443_v1, %v447_v62  ;;  %v705_v9 = vsel %vm352_vm1, %v700_v3, %v704_v4 }
  0x7f   : > { %v958_v18 = vshll.u32 %v1762_v7, 16  ;;  %v1024_v22 = vrot.slane %v1762_v7, 1 }
  0x81   : > { %v960_v29 = vrot.slane %v958_v18, 1  ;;  %v1025_v13 = vsel %vm489_vm0, %v1023_v20, %v1024_v22 }
  0x82   : > { %461 = vrot.lane.b32.xlu0 %v436_v25, %s1826_s22  ;;  %718 = vrot.lane.b32.xlu1 %v693_v27, %s1828_s25  ;;  %v769_v25 = vsel %vm489_vm0, %v767_v16, %v768_v17 }
  0x86   : > { %582 = vrot.lane.b32.xlu0 %v2133_v40, %s1821_s8  ;;  %838 = vrot.lane.b32.xlu1 %v1557_v12, %s1823_s10  ;;  %v949_v40 = vsel %vm352_vm1, %v944_v50, %v948_v46  ;;  %v953_v12 = vshll.u32 %v1558_v5, 16  ;;  %v1185_v50 = vld [vmem:[%s2346_s2 + $0x18] sm:$0xff] }
  0x88   : > { %v955_v19 = vrot.slane %v953_v12, 1 }
  0x8a   : > { %782 = vrot.lane.b32.xlu0 %v766_v45, %s1824_s11  ;;  %1038 = vrot.lane.b32.xlu1 %v1022_v47, %s1825_s21  ;;  %v956_v27 = vor.u32 %v955_v19, %v951_v63 }
  0x8e   : > { %974 = vrot.lane.b32.xlu0 %v949_v40, %s1827_s24  ;;  %528 = vrot.lane.b32.xlu1 %v513_v0, %s1822_s9 }
  0x90   : > { %v571_v15 = vpop.permute.xlu1 %570 }
  0x92   : > { %463 = vrot.lane.b32.xlu0 %v448_v8, %s1826_s22  ;;  %720 = vrot.lane.b32.xlu1 %v705_v9, %s1828_s25 }
  0x94   : > { %v515_v21 = vpop.permute.xlu0 %514  ;;  %v827_v23 = vpop.permute.xlu1 %826 }
  0x96   : > { %584 = vrot.lane.b32.xlu0 %v1534_v30, %s1821_s8  ;;  %840 = vrot.lane.b32.xlu1 %v1558_v5, %s1823_s10  ;;  %v961_v30 = vsel %vm352_vm1, %v956_v27, %v960_v29 }
  0x98   : > { %v771_v31 = vpop.permute.xlu0 %770  ;;  %v1027_v32 = vpop.permute.xlu1 %1026 }
  0x9a   : > { %784 = vrot.lane.b32.xlu0 %v769_v25, %s1824_s11  ;;  %1040 = vrot.lane.b32.xlu1 %v1025_v13, %s1825_s21  ;;  %s171_s21 = sand.u32 1, %s1795_s12   ;;  %s1580_s12 = sshll.u32 (%p1896_p5), %s1807_s15, 3 }
  0x9b   : > { %s1430_s22 = sshll.u32 %s171_s21, 5  ;;  %s1304_s25 = sadd.s32 (%p1896_p5), %s1803_s14, %s1580_s12 }
  0x9c   : > { %v450_v34 = vpop.permute.xlu0 %449  ;;  %v517_v35 = vpop.permute.xlu1 %516  ;;  %s1581_s26 = sshll.u32 (%p1896_p5), %s1304_s25, 3 }
  0x9d   : > { %v1044_v39 = vsel %vm1042_vm3, %v1929_v11, %v450_v34  ;;  %s1306_s30 = scalar_lea.vmem (%p1896_p5), %s2347_s3, %s1581_s26 }
  0x9e   : > { %v1061_v41 = vsel %vm1059_vm4, %v1044_v39, %v515_v21  ;;  %976 = vrot.lane.b32.xlu0 %v961_v30, %s1827_s24  ;;  %1193 = vperm.xlu1 %1690, %v1183_v33   ;;  %s173_s24 = scalar_lea.vmem [#allocation2], %s1430_s22 }
  0x9f   : > { %v1078_v11 = vsel %vm1076_vm5, %v1061_v41, %v571_v15 }
  0xa0   : > { %v963_v44 = vpop.permute.xlu0 %962  ;;  %v707_v45 = vpop.permute.xlu1 %706 }
  0xa1   : > { %v1095_v46 = vsel %vm1093_vm6, %v1078_v11, %v707_v45 }
  0xa2   : > { %v1112_v47 = vsel %vm1110_vm7, %v1095_v46, %v771_v31  ;;  %1188 = vperm.xlu0 %1689, %v1182_v37   ;;  %1198 = vperm.xlu1 %1690, %v1184_v43  }
  0xa3   : > { %v1129_v48 = vsel %vm1127_vm8, %v1112_v47, %v827_v23 }
  0xa4   : > { %v452_v52 = vpop.permute.xlu0 %451  ;;  %v1146_v53 = vsel %vm1144_vm9, %v1129_v48, %v963_v44  ;;  %v709_v54 = vpop.permute.xlu1 %708 }
  0xa5   : > { %v1046_v55 = vsel %vm1042_vm3, %v1947_v42, %v452_v52  ;;  %v1163_v56 = vsel %vm1161_vm10, %v1146_v53, %v1027_v32 }
  0xa6   : > { %1615 = vmatprep.subr.msk.bf16.mxu0 %vm1216_vm2, %v1163_v56  ;;  %v1223_v57 = vsel %vm1216_vm2, %v1163_v56, 0  ;;  %1203 = vperm.xlu0 %1689, %v1185_v50   ;;  %v1063_v58 = vsel %vm1059_vm4, %v1046_v55, %v517_v35 }
  0xa7   : > { %1596 = vmatpush3.bf16.xpose.msra.mxu0 %v1223_v57 }
  0xa8   : > { %v573_v59 = vpop.permute.xlu0 %572  ;;  %v829_v60 = vpop.permute.xlu1 %828 }
  0xa9   : > { %v1080_v40 = vsel %vm1076_vm5, %v1063_v58, %v573_v59 }
  0xaa   : > { %v1097_v62 = vsel %vm1093_vm6, %v1080_v40, %v709_v54 }
  0xac   : > { %v773_v0 = vpop.permute.xlu0 %772  ;;  %v1029_v1 = vpop.permute.xlu1 %1028 }
  0xad   : > { %v1114_v42 = vsel %vm1110_vm7, %v1097_v62, %v773_v0 }
  0xae   : > { %v1131_v2 = vsel %vm1127_vm8, %v1114_v42, %v829_v60 }
  0xb0   : > { %v965_v3 = vpop.permute.xlu0 %964  ;;  %v519_v4 = vpop.permute.xlu1 %518 }
  0xb1   : > { %v1148_v5 = vsel %vm1144_vm9, %v1131_v2, %v965_v3 }
  0xb2   : > { %v1165_v6 = vsel %vm1161_vm10, %v1148_v5, %v1029_v1 }
  0xb3   : > { %1616 = vmatprep.subr.msk.bf16.mxu0 %vm1216_vm2, %v1165_v6  ;;  %v1225_v51 = vsel %vm1216_vm2, %v1165_v6, 0 }
  0xb4   : > { %1598 = vmatpush3.bf16.xpose.msra.mxu0 %v1225_v51  ;;  %v454_v7 = vpop.permute.xlu0 %453  ;;  %v711_v8 = vpop.permute.xlu1 %710 }
  0xb5   : > { %v1048_v9 = vsel %vm1042_vm3, %v1974_v26, %v454_v7 }
  0xb6   : > { %v1065_v12 = vsel %vm1059_vm4, %v1048_v9, %v519_v4 }
  0xb8   : > { %v575_v14 = vpop.permute.xlu0 %574  ;;  %v831_v15 = vpop.permute.xlu1 %830 }
  0xb9   : > { %v1082_v16 = vsel %vm1076_vm5, %v1065_v12, %v575_v14 }
  0xba   : > { %v1099_v17 = vsel %vm1093_vm6, %v1082_v16, %v711_v8 }
  0xbc   : > { %v775_v18 = vpop.permute.xlu0 %774  ;;  %v1031_v63 = vpop.permute.xlu1 %1030 }
  0xbd   : > { %v1116_v19 = vsel %vm1110_vm7, %v1099_v17, %v775_v18 }
  0xbe   : > { %v1133_v20 = vsel %vm1127_vm8, %v1116_v19, %v831_v15 }
  0xc0   : > { %v967_v22 = vpop.permute.xlu0 %966  ;;  %v521_v21 = vpop.permute.xlu1 %520 }
  0xc1   : > { %v1150_v23 = vsel %vm1144_vm9, %v1133_v20, %v967_v22 }
  0xc2   : > { %v1167_v26 = vsel %vm1161_vm10, %v1150_v23, %v1031_v63 }
  0xc3   : > { %1617 = vmatprep.subr.msk.bf16.mxu0 %vm1216_vm2, %v1167_v26  ;;  %v1227_v24 = vsel %vm1216_vm2, %v1167_v26, 0 }
  0xc4   : > { %1600 = vmatpush3.bf16.xpose.msra.mxu0 %v1227_v24  ;;  %v456_v25 = vpop.permute.xlu0 %455  ;;  %v713_v27 = vpop.permute.xlu1 %712 }
  0xc5   : > { %v1050_v29 = vsel %vm1042_vm3, %v2012_v10, %v456_v25 }
  0xc6   : > { %v1067_v13 = vsel %vm1059_vm4, %v1050_v29, %v521_v21 }
  0xc8   : > { %v577_v31 = vpop.permute.xlu0 %576  ;;  %v833_v32 = vpop.permute.xlu1 %832 }
  0xc9   : > { %v1084_v30 = vsel %vm1076_vm5, %v1067_v13, %v577_v31 }
  0xca   : > { %v1101_v33 = vsel %vm1093_vm6, %v1084_v30, %v713_v27 }
  0xcc   : > { %v777_v34 = vpop.permute.xlu0 %776  ;;  %v1033_v35 = vpop.permute.xlu1 %1032 }
  0xcd   : > { %v1118_v36 = vsel %vm1110_vm7, %v1101_v33, %v777_v34 }
  0xce   : > { %v1135_v39 = vsel %vm1127_vm8, %v1118_v36, %v833_v32 }
  0xd0   : > { %v969_v41 = vpop.permute.xlu0 %968  ;;  %v523_v37 = vpop.permute.xlu1 %522 }
  0xd1   : > { %v1152_v43 = vsel %vm1144_vm9, %v1135_v39, %v969_v41 }
  0xd2   : > { %v1169_v10 = vsel %vm1161_vm10, %v1152_v43, %v1033_v35 }
  0xd3   : > { %1618 = vmatprep.subr.msk.bf16.mxu0 %vm1216_vm2, %v1169_v10  ;;  %v1229_v44 = vsel %vm1216_vm2, %v1169_v10, 0 }
  0xd4   : > { %1602 = vmatpush3.bf16.xpose.msra.mxu0 %v1229_v44  ;;  %v458_v45 = vpop.permute.xlu0 %457  ;;  %v715_v11 = vpop.permute.xlu1 %714 }
  0xd5   : > { %v1052_v46 = vsel %vm1042_vm3, %v2051_v61, %v458_v45 }
  0xd6   : > { %v1069_v47 = vsel %vm1059_vm4, %v1052_v46, %v523_v37 }
  0xd8   : > { %v579_v48 = vpop.permute.xlu0 %578  ;;  %v835_v50 = vpop.permute.xlu1 %834 }
  0xd9   : > { %v1086_v52 = vsel %vm1076_vm5, %v1069_v47, %v579_v48  ;;  %v1764_v47 = vld [vmem:[%s2345_s1 + $0x8] sm:$0xff]  }
  0xda   : > { %v1103_v53 = vsel %vm1093_vm6, %v1086_v52, %v715_v11 }
  0xdc   : > { %v779_v54 = vpop.permute.xlu0 %778  ;;  %v1035_v55 = vpop.permute.xlu1 %1034 }
  0xdd   : > { %v1120_v56 = vsel %vm1110_vm7, %v1103_v53, %v779_v54 }
  0xde   : > { %v1137_v57 = vsel %vm1127_vm8, %v1120_v56, %v835_v50 }
  0xe0   : > { %v971_v58 = vpop.permute.xlu0 %970  ;;  %v525_v59 = vpop.permute.xlu1 %524 }
  0xe1   : > { %v1154_v60 = vsel %vm1144_vm9, %v1137_v57, %v971_v58 }
  0xe2   : > { %v1171_v61 = vsel %vm1161_vm10, %v1154_v60, %v1035_v55 }
  0xe3   : > { %1619 = vmatprep.subr.msk.bf16.mxu0 %vm1216_vm2, %v1171_v61  ;;  %v1231_v40 = vsel %vm1216_vm2, %v1171_v61, 0 }
  0xe4   : > { %1604 = vmatpush3.bf16.xpose.msra.mxu0 %v1231_v40  ;;  %v460_v62 = vpop.permute.xlu0 %459  ;;  %v717_v0 = vpop.permute.xlu1 %716 }
  0xe5   : > { %v1054_v1 = vsel %vm1042_vm3, %v2090_v49, %v460_v62 }
  0xe6   : > { %v1071_v42 = vsel %vm1059_vm4, %v1054_v1, %v525_v59 }
  0xe8   : > { %v581_v2 = vpop.permute.xlu0 %580  ;;  %v837_v3 = vpop.permute.xlu1 %836 }
  0xe9   : > { %v1088_v4 = vsel %vm1076_vm5, %v1071_v42, %v581_v2 }
  0xea   : > { %v1105_v5 = vsel %vm1093_vm6, %v1088_v4, %v717_v0 }
  0xec   : > { %v781_v6 = vpop.permute.xlu0 %780  ;;  %v1037_v51 = vpop.permute.xlu1 %1036 }
  0xed   : > { %v1122_v7 = vsel %vm1110_vm7, %v1105_v5, %v781_v6 }
  0xee   : > { %v1139_v8 = vsel %vm1127_vm8, %v1122_v7, %v837_v3 }
  0xf0   : > { %v973_v9 = vpop.permute.xlu0 %972  ;;  %v527_v12 = vpop.permute.xlu1 %526 }
  0xf1   : > { %v1156_v14 = vsel %vm1144_vm9, %v1139_v8, %v973_v9 }
  0xf2   : > { %v1173_v49 = vsel %vm1161_vm10, %v1156_v14, %v1037_v51 }
  0xf3   : > { %1620 = vmatprep.subr.msk.bf16.mxu0 %vm1216_vm2, %v1173_v49  ;;  %v1233_v15 = vsel %vm1216_vm2, %v1173_v49, 0 }
  0xf4   : > { %1606 = vmatpush3.bf16.xpose.msra.mxu0 %v1233_v15  ;;  %v462_v16 = vpop.permute.xlu0 %461  ;;  %v719_v17 = vpop.permute.xlu1 %718 }
  0xf5   : > { %v1056_v18 = vsel %vm1042_vm3, %v2129_v38, %v462_v16 }
  0xf6   : > { %v1073_v63 = vsel %vm1059_vm4, %v1056_v18, %v527_v12 }
  0xf8   : > { %v583_v19 = vpop.permute.xlu0 %582  ;;  %v839_v20 = vpop.permute.xlu1 %838 }
  0xf9   : > { %v1090_v22 = vsel %vm1076_vm5, %v1073_v63, %v583_v19 }
  0xfa   : > { %v1107_v21 = vsel %vm1093_vm6, %v1090_v22, %v719_v17 }
  0xfc   : > { %v783_v23 = vpop.permute.xlu0 %782  ;;  %v1039_v26 = vpop.permute.xlu1 %1038 }
  0xfd   : > { %v1124_v24 = vsel %vm1110_vm7, %v1107_v21, %v783_v23 }
  0xfe   : > { %v1141_v25 = vsel %vm1127_vm8, %v1124_v24, %v839_v20 }
 0x100   : > { %v975_v27 = vpop.permute.xlu0 %974  ;;  %v529_v29 = vpop.permute.xlu1 %528 }
 0x101   : > { %v1158_v13 = vsel %vm1144_vm9, %v1141_v25, %v975_v27 }
 0x102   : > { %v1175_v38 = vsel %vm1161_vm10, %v1158_v13, %v1039_v26 }
 0x103   : > { %1621 = vmatprep.subr.msk.bf16.mxu0 %vm1216_vm2, %v1175_v38  ;;  %v1235_v31 = vsel %vm1216_vm2, %v1175_v38, 0 }
 0x104   : > { %1608 = vmatpush3.bf16.xpose.msra.mxu0 %v1235_v31  ;;  %v464_v32 = vpop.permute.xlu0 %463  ;;  %v721_v30 = vpop.permute.xlu1 %720 }
 0x105   : > { %v1058_v33 = vsel %vm1042_vm3, %v2168_v28, %v464_v32 }
 0x106   : > { %v1075_v34 = vsel %vm1059_vm4, %v1058_v33, %v529_v29 }
 0x108   : > { %v585_v35 = vpop.permute.xlu0 %584  ;;  %v841_v39 = vpop.permute.xlu1 %840 }
 0x109   : > { %v1092_v36 = vsel %vm1076_vm5, %v1075_v34, %v585_v35 }
 0x10a   : > { %v1109_v41 = vsel %vm1093_vm6, %v1092_v36, %v721_v30 }
 0x10c   : > { %v785_v37 = vpop.permute.xlu0 %784  ;;  %v1041_v10 = vpop.permute.xlu1 %1040 }
 0x10d   : > { %v1126_v43 = vsel %vm1110_vm7, %v1109_v41, %v785_v37 }
 0x10e   : > { %v1143_v44 = vsel %vm1127_vm8, %v1126_v43, %v841_v39 }
 0x110   : > { %v977_v45 = vpop.permute.xlu0 %976 }
 0x111   : > { %v1160_v11 = vsel %vm1144_vm9, %v1143_v44, %v977_v45 }
 0x112   : > { %v1177_v28 = vsel %vm1161_vm10, %v1160_v11, %v1041_v10 }
 0x113   : > { %1622 = vmatprep.subr.msk.bf16.mxu0 %vm1216_vm2, %v1177_v28  ;;  %v1237_v46 = vsel %vm1216_vm2, %v1177_v28, 0 }
 0x114   : > { %1610 = vmatpush3.bf16.xpose.msra.mxu0 %v1237_v46 }
 0x11b   : > { %1612 = vmatmul.mubr.msk.bf16.vlgmr.msra.gmra.mrb[0].mxu0 %vm1216_vm2, %v1764_v47 }
 0x11d   : > { %v1194_v48 = vpop.permute.xlu1 %1193 }
 0x121   : > { %v1189_v50 = vpop.permute.xlu0 %1188  ;;  %v1199_v52 = vpop.permute.xlu1 %1198 }
 0x125   : > { %v1204_v56 = vpop.permute.xlu0 %1203 }
 0x1ee   : > { %v1613_v53 = vpop.f32.mrb[0].mxu0 }
 0x1ef   : > { %v1282_v54 = vadd.f32 %v1613_v53, %v1199_v52  ;;  %v1273_v55 = vpop.f32.mrb[1].mxu0 }
 0x1f0   : > { %v1274_v57 = vadd.f32 %v1273_v55, %v1189_v50  ;;  %v1614_v58 = vpop.f32.mrb[2].mxu0  ;;  %1302 = sbr.rel (!%p1896_p5) target bundleno = 511 (0x1ff), region = 36 }
 0x1f1   : > { %v1290_v59 = vmax.f32 %v1282_v54, 0.0  ;;  %v1285_v60 = vadd.f32 %v1614_v58, %v1204_v56  ;;  %v1276_v61 = vpop.f32.mrb[3].mxu0 }
 0x1f2   : > { %v1288_v40 = vmax.f32 %v1274_v57, 0.0  ;;  %v1277_v62 = vadd.f32 %v1276_v61, %v1194_v48 }
 0x1f3   : > { %1294 = vst [vmem:[%s173_s24 + $0x10] sm:$0xff] %v1290_v59  ;;  %v1291_v0 = vmax.f32 %v1285_v60, 0.0 }
 0x1f4   : > { %1292 = vst [vmem:[%s173_s24] sm:$0xff] %v1288_v40  ;;  %v1289_v1 = vmax.f32 %v1277_v62, 0.0 }
 0x1f5   : > { %1295 = vst [vmem:[%s173_s24 + $0x18] sm:$0xff] %v1291_v0 }
 0x1f6   : > { %1293 = vst [vmem:[%s173_s24 + $0x8] sm:$0xff] %v1289_v1 }
 0x1fa   : > { %v1344_v3 = vld [vmem:[%s173_s24 + $0x10] sm:$0xff] }
 0x1fb   : > { %v1340_v42 = vld [vmem:[%s173_s24] sm:$0xff]  ;;  %1345 = vst [vmem:[%s1306_s30 + $0x20] sm:$0xff] %v1344_v3 }
 0x1fc   : > { %v1346_v4 = vld [vmem:[%s173_s24 + $0x18] sm:$0xff]  ;;  %1341 = vst [vmem:[%s1306_s30] sm:$0xff] %v1340_v42 }
 0x1fd   : > { %v1342_v2 = vld [vmem:[%s173_s24 + $0x8] sm:$0xff]  ;;  %1347 = vst [vmem:[%s1306_s30 + $0x30] sm:$0xff] %v1346_v4 }
 0x1fe   : > { %1343 = vst [vmem:[%s1306_s30 + $0x10] sm:$0xff] %v1342_v2 }
 0x1ff PF: > { %s13_s18 = sadd.s32 1, %s1819_s18   ;;  %s2349_s12 = smov %s1799_s13 }
 0x200   : > { %p10_p10 = scmp.ge.s32.totalorder %s13_s18, 6   ;;  %s2350_s13 = smov %s1907_s27 }
 0x201   : > { %s2351_s14 = smov %s1811_s16  ;;  %s2352_s15 = smov %s1815_s17 }
 0x202   : > { %s2353_s16 = smov %s2356_s19  ;;  %s2354_s17 = smov %s2360_s20 }
 0x203   :  { %12 = sbr.rel (!%p10_p10) target bundleno = 4 (0x4), region = 103 }

</bundles_post_ra>
